<compile_context>
chip_gen: v6e
topology: v6e:2x2x1
jax: 0.10.0
libtpu: 0.0.40
codegen_flags: <defaults>
</compile_context>

<pallas_src>
import functools

import jax
import jax.numpy as jnp
from jax.experimental import pallas as pl
from jax.experimental.pallas import tpu as pltpu


def _glm_mlp_kernel(x_ref, w1_ref, w2_ref, o_ref, acc_ref, *, f_block):
    """One (token_tile, f_block) step of the fused MLP."""
    f = pl.program_id(1)

    @pl.when(f == 0)
    def _init():
        acc_ref[...] = jnp.zeros_like(acc_ref)

    x = x_ref[...]                                                 # (tm, H)
    # Single fused MXU matmul for this F block's gate|up: (tm, 2*f_block).
    inter = jnp.dot(x, w1_ref[...], preferred_element_type=jnp.float32)
    gate = inter[:, :f_block]
    up = inter[:, f_block:]
    act = (gate * jax.nn.sigmoid(gate)) * up                       # SiluAndMul (f32)
    # Accumulate this F-slab's contribution to the output projection.
    acc_ref[...] += jnp.dot(act.astype(w2_ref.dtype), w2_ref[...],
                            preferred_element_type=jnp.float32)    # (tm, H)

    @pl.when(f == pl.num_programs(1) - 1)
    def _finalize():
        o_ref[...] = acc_ref[...].astype(o_ref.dtype)


def _round_up(x, m):
    return ((x + m - 1) // m) * m


def prepare_glm_mlp_weights(w1, w2, *, f_block=None, weight_dtype=jnp.bfloat16):
    """One-time weight re-layout + downcast (do at checkpoint-load time only).

    w1: [2*F, H]  PyTorch dense_h_to_4h weight (rows 0:F gate, F:2F up,
                  matching MergedColumnParallelLinear concat order).
    w2: [H, F]    PyTorch dense_4h_to_h weight.

    F is zero-padded up to a multiple of f_block (default 512) so real model
    shapes (e.g. F=13696) keep a large MXU-friendly F tile.  Returns
    (w1_packed [H, 2*F_pad], w2_t [F_pad, H], f_block) where w1_packed block f
    (width 2*f_block) is [gate_f | up_f].
    """
    two_f, H = w1.shape
    F = two_f // 2
    if f_block is None:
        f_block = 512 if F >= 512 else _round_up(F, 128)
    assert f_block % 128 == 0
    F_pad = _round_up(F, f_block)
    nf = F_pad // f_block

    w_gate = jnp.zeros((H, F_pad), w1.dtype).at[:, :F].set(w1[:F, :].T)
    w_up = jnp.zeros((H, F_pad), w1.dtype).at[:, :F].set(w1[F:, :].T)
    w1_packed = jnp.stack(
        [w_gate.reshape(H, nf, f_block), w_up.reshape(H, nf, f_block)], axis=2
    ).reshape(H, 2 * F_pad)
    w2_t = jnp.zeros((F_pad, H), w2.dtype).at[:F, :].set(w2.T)
    # TODO(synk): optional fp8 (v7x) / int8 (v6e) weight quantization with
    # per-block scales for the weight-BW-bound decode regime.
    return (w1_packed.astype(weight_dtype),
            w2_t.astype(weight_dtype),
            f_block)


def _vmem_capacity_bytes():
    """Physical VMEM of this chip (64 MiB on v7x, 128 MiB on v5e/v6e)."""
    try:
        cap = getattr(pltpu.get_tpu_info(), "vmem_capacity_bytes", None)
        if cap:
            return int(cap)
    except Exception:
        pass
    return 64 << 20   # conservative fallback (v7x per-TensorCore)


def glm_mlp(hidden_states, w1_packed, w2_t, f_block, *, block_tokens=None):
    """GLMMLP forward with pre-packed weights.

    hidden_states: [T, H]
    w1_packed:     [H, 2*F_pad]  (from prepare_glm_mlp_weights)
    w2_t:          [F_pad, H]
    """
    T, H = hidden_states.shape
    F_pad, H2 = w2_t.shape
    assert H2 == H and w1_packed.shape == (H, 2 * F_pad) and F_pad % f_block == 0
    nf = F_pad // f_block

    x_bytes = jnp.dtype(hidden_states.dtype).itemsize
    w_bytes = jnp.dtype(w1_packed.dtype).itemsize
    vmem_cap = _vmem_capacity_bytes()
    budget = vmem_cap - (8 << 20)            # headroom for Mosaic internals

    def per_step_vmem(tm_):
        # Double-buffered pipeline tiles + resident f32 accumulator +
        # f32 inter/act temporaries (previously un-budgeted).
        tiles = (tm_ * H * x_bytes               # x tile
                 + H * 2 * f_block * w_bytes     # [gate|up] W1 slab
                 + f_block * H * w_bytes         # W2 slab
                 + tm_ * H * x_bytes)            # out tile
        acc = tm_ * H * 4
        temps = tm_ * 2 * f_block * 4 + tm_ * f_block * 4
        return 2 * tiles + acc + temps

    sub = 16 if x_bytes < 4 else 8               # packed-sublane token alignment
    if block_tokens is None:
        # Prefill default: largest 128-aligned token tile that fits VMEM.
        # Large tm raises arithmetic intensity (weights are re-streamed per
        # token tile) so v6e/v7x reach the MXU roofline instead of HBM-bound.
        tm = 128
        for cand in (1024, 512, 256, 128):
            if per_step_vmem(cand) <= budget:
                tm = cand
                break
    else:
        tm = max(sub, (block_tokens // sub) * sub)
    if T <= tm:
        tm = T                                   # decode / small batch: one block
        # TODO(synk): v7x decode could core-split the F axis across both
        # TensorCores (two partial accumulators) instead of an idle core.

    grid = (pl.cdiv(T, tm), nf)

    vmem_limit = int(per_step_vmem(tm)) + (4 << 20)
    vmem_limit = max(16 << 20, min(vmem_limit, vmem_cap))

    n_token_tiles = pl.cdiv(T, tm)
    cost = pl.CostEstimate(
        flops=6 * T * F_pad * H,                 # 2*T*H*2F + 2*T*F*H
        transcendentals=T * F_pad,               # sigmoid per gate element
        bytes_accessed=(2 * T * H * x_bytes
                        + n_token_tiles * 3 * F_pad * H * w_bytes),
    )

    kernel = functools.partial(_glm_mlp_kernel, f_block=f_block)

    return pl.pallas_call(
        kernel,
        out_shape=jax.ShapeDtypeStruct((T, H), hidden_states.dtype),
        grid_spec=pltpu.PrefetchScalarGridSpec(
            num_scalar_prefetch=0,
            grid=grid,
            in_specs=[
                pl.BlockSpec((tm, H), lambda i, f: (i, 0)),            # x tile
                pl.BlockSpec((H, 2 * f_block), lambda i, f: (0, f)),   # [gate|up] slab
                pl.BlockSpec((f_block, H), lambda i, f: (f, 0)),       # W2 slab
            ],
            out_specs=pl.BlockSpec((tm, H), lambda i, f: (i, 0)),
            scratch_shapes=[pltpu.VMEM((tm, H), jnp.float32)],         # accumulator
        ),
        compiler_params=pltpu.CompilerParams(
            dimension_semantics=("parallel", "arbitrary"),
            vmem_limit_bytes=vmem_limit,
        ),
        cost_estimate=cost,
    )(hidden_states, w1_packed, w2_t)


def glm_mlp_reference(hidden_states, w1, w2):
    """Pure-JAX f32 reference matching the PyTorch module semantics."""
    F = w1.shape[0] // 2
    x = hidden_states.astype(jnp.float32)
    inter = x @ w1.astype(jnp.float32).T                   # (T, 2F)
    gate, up = inter[:, :F], inter[:, F:]
    return (jax.nn.silu(gate) * up) @ w2.astype(jnp.float32).T


if __name__ == "__main__":
    # Small, module-consistent shapes.  FFN=320 is deliberately NOT a multiple
    # of the F tile so the zero-padding path is exercised.
    T, H, FFN = 32, 128, 320
    key = jax.random.PRNGKey(0)
    kx, k1, k2 = jax.random.split(key, 3)

    x_f32 = jax.random.normal(kx, (T, H), dtype=jnp.float32)
    # dense_h_to_4h weight: [2*ffn_hidden_size, hidden_size]
    w1 = jax.random.normal(k1, (2 * FFN, H), dtype=jnp.float32) * 0.05
    # dense_4h_to_h weight: [hidden_size, ffn_hidden_size]
    w2 = jax.random.normal(k2, (H, FFN), dtype=jnp.float32) * 0.05
    # TODO(synk): config.add_bias_linear=False for ChatGLM; bias path omitted.

    # ---- Production path: bf16 weights + bf16 activations, default tiling ----
    w1p_bf, w2t_bf, fb = prepare_glm_mlp_weights(
        w1, w2, f_block=128, weight_dtype=jnp.bfloat16)
    x_bf = x_f32.astype(jnp.bfloat16)
    out_bf = jax.block_until_ready(glm_mlp(x_bf, w1p_bf, w2t_bf, fb))
    ref_bf = jax.block_until_ready(
        glm_mlp_reference(x_bf, w1.astype(jnp.bfloat16), w2.astype(jnp.bfloat16)))
    assert out_bf.shape == (T, H) and out_bf.dtype == x_bf.dtype
    err_bf = float(jnp.max(jnp.abs(out_bf.astype(jnp.float32) - ref_bf)))
    assert err_bf < 3e-2, err_bf

    # ---- f32 path with an explicit small token tile (exercises the token grid) ----
    w1p_f32, w2t_f32, fb32 = prepare_glm_mlp_weights(
        w1, w2, f_block=128, weight_dtype=jnp.float32)
    out_f32 = jax.block_until_ready(
        glm_mlp(x_f32, w1p_f32, w2t_f32, fb32, block_tokens=16))
    ref_f32 = jax.block_until_ready(glm_mlp_reference(x_f32, w1, w2))
    err_f32 = float(jnp.max(jnp.abs(out_f32 - ref_f32)))
    assert out_f32.shape == (T, H) and out_f32.dtype == x_f32.dtype
    assert err_f32 < 2e-2, err_f32

    print("KERNEL_OK")
</pallas_src>

<mosaic_0001>
module attributes {stable_mosaic.version = 11 : i64} {
  func.func @_glm_mlp_kernel(%arg0: i32, %arg1: i32, %arg2: memref<32x128xbf16, #tpu.memory_space<vmem>>, %arg3: memref<128x256xbf16, #tpu.memory_space<vmem>>, %arg4: memref<128x128xbf16, #tpu.memory_space<vmem>>, %arg5: memref<32x128xbf16, #tpu.memory_space<vmem>>, %arg6: memref<32x128xf32, #tpu.memory_space<vmem>>) attributes {dimension_semantics = [#tpu.dimension_semantics<parallel>, #tpu.dimension_semantics<arbitrary>], iteration_bounds = array<i64: 1, 3>, scalar_prefetch = 0 : i64, scratch_operands = 1 : i64, tpu.core_type = #tpu.core_type<tc>, window_params = [{transform_indices = @transform_0, window_bounds = array<i64: 32, 128>}, {transform_indices = @transform_1, window_bounds = array<i64: 128, 256>}, {transform_indices = @transform_2, window_bounds = array<i64: 128, 128>}, {transform_indices = @transform_3, window_bounds = array<i64: 32, 128>}]} {
    %c0_i32 = arith.constant 0 : i32
    %0 = arith.cmpi eq, %arg1, %c0_i32 : i32
    %1 = arith.extui %0 : i1 to i32
    %c0_i32_0 = arith.constant 0 : i32
    %2 = arith.cmpi ne, %1, %c0_i32_0 : i32
    scf.if %2 {
      %cst_13 = arith.constant 0.000000e+00 : f32
      %24 = vector.broadcast %cst_13 : f32 to vector<32x128xf32>
      %c0_14 = arith.constant 0 : index
      %c0_15 = arith.constant 0 : index
      %25 = vector.load %arg6[%c0_14, %c0_15] : memref<32x128xf32, #tpu.memory_space<vmem>>, vector<32x128xf32>
      tpu.vector_store %arg6[%c0_14, %c0_15], %24 {strides = array<i32>} : memref<32x128xf32, #tpu.memory_space<vmem>>, vector<32x128xf32>,
    } else {
    }
    %c0 = arith.constant 0 : index
    %c0_1 = arith.constant 0 : index
    %3 = vector.load %arg2[%c0, %c0_1] : memref<32x128xbf16, #tpu.memory_space<vmem>>, vector<32x128xbf16>
    %c0_2 = arith.constant 0 : index
    %c0_3 = arith.constant 0 : index
    %4 = vector.load %arg3[%c0_2, %c0_3] : memref<128x256xbf16, #tpu.memory_space<vmem>>, vector<128x256xbf16>
    %cst = arith.constant dense<0.000000e+00> : vector<32x256xf32>
    %5 = tpu.matmul %3, %4, %cst {dimension_numbers = #tpu.dot_dimension_numbers<[1], [0], [0], [1], [0, 0, 1, 1], [], []>} : vector<32x128xbf16>, vector<128x256xbf16>, vector<32x256xf32> -> vector<32x256xf32>
    %6 = vector.extract_strided_slice %5 {offsets = [0, 0], sizes = [32, 128], strides = [1, 1]} : vector<32x256xf32> to vector<32x128xf32>
    %7 = vector.extract_strided_slice %5 {offsets = [0, 128], sizes = [32, 128], strides = [1, 1]} : vector<32x256xf32> to vector<32x128xf32>
    %8 = arith.negf %6 : vector<32x128xf32>
    %9 = math.exp %8 : vector<32x128xf32>
    %cst_4 = arith.constant 1.000000e+00 : f32
    %10 = vector.broadcast %cst_4 : f32 to vector<32x128xf32>
    %11 = arith.addf %10, %9 : vector<32x128xf32>
    %12 = arith.divf %10, %11 : vector<32x128xf32>
    %13 = arith.mulf %6, %12 : vector<32x128xf32>
    %14 = arith.mulf %13, %7 : vector<32x128xf32>
    %c0_5 = arith.constant 0 : index
    %c0_6 = arith.constant 0 : index
    %15 = vector.load %arg6[%c0_5, %c0_6] : memref<32x128xf32, #tpu.memory_space<vmem>>, vector<32x128xf32>
    %16 = arith.truncf %14 : vector<32x128xf32> to vector<32x128xbf16>
    %c0_7 = arith.constant 0 : index
    %c0_8 = arith.constant 0 : index
    %17 = vector.load %arg4[%c0_7, %c0_8] : memref<128x128xbf16, #tpu.memory_space<vmem>>, vector<128x128xbf16>
    %cst_9 = arith.constant dense<0.000000e+00> : vector<32x128xf32>
    %18 = tpu.matmul %16, %17, %cst_9 {dimension_numbers = #tpu.dot_dimension_numbers<[1], [0], [0], [1], [0, 0, 1, 1], [], []>} : vector<32x128xbf16>, vector<128x128xbf16>, vector<32x128xf32> -> vector<32x128xf32>
    %19 = arith.addf %15, %18 : vector<32x128xf32>
    %c0_10 = arith.constant 0 : index
    %c0_11 = arith.constant 0 : index
    %20 = vector.load %arg6[%c0_10, %c0_11] : memref<32x128xf32, #tpu.memory_space<vmem>>, vector<32x128xf32>
    tpu.vector_store %arg6[%c0_10, %c0_11], %19 {strides = array<i32>} : memref<32x128xf32, #tpu.memory_space<vmem>>, vector<32x128xf32>,
    %c2_i32 = arith.constant 2 : i32
    %21 = arith.cmpi eq, %arg1, %c2_i32 : i32
    %22 = arith.extui %21 : i1 to i32
    %c0_i32_12 = arith.constant 0 : i32
    %23 = arith.cmpi ne, %22, %c0_i32_12 : i32
    scf.if %23 {
      %c0_13 = arith.constant 0 : index
      %c0_14 = arith.constant 0 : index
      %24 = vector.load %arg6[%c0_13, %c0_14] : memref<32x128xf32, #tpu.memory_space<vmem>>, vector<32x128xf32>
      %25 = arith.truncf %24 : vector<32x128xf32> to vector<32x128xbf16>
      %c0_15 = arith.constant 0 : index
      %c0_16 = arith.constant 0 : index
      %26 = vector.load %arg5[%c0_15, %c0_16] : memref<32x128xbf16, #tpu.memory_space<vmem>>, vector<32x128xbf16>
      tpu.vector_store %arg5[%c0_15, %c0_16], %25 {strides = array<i32>} : memref<32x128xbf16, #tpu.memory_space<vmem>>, vector<32x128xbf16>,
    } else {
    }
    return
  }
  func.func @transform_0(%arg0: i32, %arg1: i32) -> (i32, i32) {
    %c0_i32 = arith.constant 0 : i32
    %c0_i32_0 = arith.constant 0 : i32
    return %arg0, %c0_i32 : i32, i32
  }
  func.func @transform_1(%arg0: i32, %arg1: i32) -> (i32, i32) {
    %c0_i32 = arith.constant 0 : i32
    %c0_i32_0 = arith.constant 0 : i32
    return %c0_i32, %arg1 : i32, i32
  }
  func.func @transform_2(%arg0: i32, %arg1: i32) -> (i32, i32) {
    %c0_i32 = arith.constant 0 : i32
    %c0_i32_0 = arith.constant 0 : i32
    return %arg1, %c0_i32 : i32, i32
  }
  func.func @transform_3(%arg0: i32, %arg1: i32) -> (i32, i32) {
    %c0_i32 = arith.constant 0 : i32
    %c0_i32_0 = arith.constant 0 : i32
    return %arg0, %c0_i32 : i32, i32
  }
}

</mosaic_0001>

<bundles_post_ra>
// kernel: tpu_custom_call.1
= control target key start
LH: loop header
LB: loop body
LE: loop exit
PB: predicated region body
PF: predicated region fallthrough
CT: control target
= control target key end

     0   :  { %8 = vsyncpa [#allocation4], 0  ;;  %s1354_s0 = inlined_call_operand.hbm [shape: bf16[32,128], index: 0, kind: input, shape index: {}]   ;;  %s1355_s1 = inlined_call_operand.hbm [shape: bf16[128,768], index: 1, kind: input, shape index: {}]   ;;  %s1356_s2 = inlined_call_operand.hbm [shape: bf16[384,128], index: 2, kind: input, shape index: {}]   ;;  %s1357_s3 = inlined_call_operand.hbm [shape: bf16[32,128], index: 3, kind: output, shape index: {}]  }
   0x1   :  { %9 = vsyncpa [#allocation7], 0 }
   0x2   :  { %11 = vsyncpa [#allocation7 + $0x1], 0 }
   0x3   :  { %12 = vsyncpa [#allocation5], 0  ;;  %s1163_s12 = smov 0   ;;  %s1165_s13 = smov 0  }
   0x4   :  { %s1167_s14 = smov 0   ;;  %s1169_s15 = smov 0  }
   0x5   :  { %s1171_s16 = smov 0   ;;  %s1173_s17 = smov 0  }
   0x6 LB: > { %s27_s18 = sadd.s32 1, %s1124_s16  ;;  %s63_s19 = sadd.s32 1, %s1116_s14  ;;  %s1128_s17 = sphi %s1173_s17, %s18_s17   ;;  %s1124_s16 = sphi %s1171_s16, %s1366_s16   ;;  %s1120_s15 = sphi %s1169_s15, %s1365_s15   ;;  %s1116_s14 = sphi %s1167_s14, %s1364_s14   ;;  %s1112_s13 = sphi %s1165_s13, %s1363_s13   ;;  %s1108_s12 = sphi %s1163_s12, %s1362_s12  }
   0x7   : > { %p28_p0 = scmp.ge.s32.totalorder %s27_s18, 3  ;;  %p70_p1 = scmp.ne.s32.totalorder %s1116_s14, %s1112_s13 }
   0x8   : > { %p71_p2 = scmp.eq.s32.totalorder %s1128_s17, 0  ;;  %p851_p4 = scmp.lt.s32.totalorder %s1128_s17, 3 }
   0x9   : > { %s1368_s18 = smov (%p28_p0, %s27_s18), 0  ;;  %s168_s21 = sand.u32 1, %s1128_s17  }
   0xa   : > { %p72_p3 = por %p71_p2, %p70_p1  ;;  %s60_s20 = ssub.s32 %s1124_s16, %s1368_s18 }
   0xb   : > { %p61_p5 = scmp.eq.s32.totalorder %s60_s20, 0  ;;  %s170_s22 = sand.u32 1, %s1116_s14  }
   0xc   : > { %s780_s23 = sshll.u32 %s1124_s16, 7  ;;  %s730_s25 = sshll.u32 %s170_s22, 7 }
   0xd   : > { %s1207_s24 = scalar_select %p61_p5, %s1116_s14, %s63_s19  }
   0xe   : > { %s178_s28 = scalar_lea.hbm %s1355_s1, %s780_s23  ;;  %p1214_p6 = pnand %p851_p4, %p72_p3 }
   0xf   : > { %s172_s30 = scalar_lea.vmem [#allocation6], %s730_s25  ;;  %s1218_s5 = scalar_lea.sflag [#allocation7], %s168_s21 }
  0x10   : > { %s179_s4 = sshll.u32 %s172_s30, 4  ;;  %p966_p7 = pneg %p1214_p6  ;;  %s180_s4 = int_to_ptr.vmem [resolvable:$true] %s179_s4 }
  0x11   : > { %s977_s6 = scalar_lea.vmem %s180_s4, 2048  ;;  %s1130_s7 = smov [#allocation6]  }
  0x12   : > { %p978_p8 = scmp.ne.s32.totalorder %s180_s4, %s977_s6  ;;  %s982_s8 = sshll.u32 %s1130_s7, 4  ;;  %s983_s8 = int_to_ptr.vmem [resolvable:$false] %s982_s8 }
  0x13   : > { %s984_s9 = scalar_lea.vmem %s983_s8, 4096  ;;  %p985_p11 = scmp.lt.s32.totalorder %s180_s4, %s983_s8 }
  0x14   : > { %p980_p9 = pnand %p978_p8, %p966_p7  ;;  %p986_p12 = scmp.lt.s32.totalorder %s984_s9, %s977_s6 }
  0x16   : > { %p981_p10 = pneg %p980_p9  ;;  %p987_p13 = por %p986_p12, %p985_p11 }
  0x18   : > { %p988_p0 = pnand %p987_p13, %p981_p10 }
  0x1a   : > { %991 = shalt.err (!%p988_p0)
}
  0x1b   : > { %s1131_s10 = smov 384   ;;  %s1132_s11 = smov 128  }
  0x1c   : > { %s1133_s19 = smov 8   ;;  %s1229_s20 = sadd.s32 4294967295, %s1128_s17  }
  0x1d   : > { %846 = dma.hbm_to_vmem [thread:$0]  (!%p1214_p6), %s178_s28, 2048, %s180_s4, %s1218_s5, %s1131_s10, %s1132_s11, %s1133_s19  }
  0x1e   : > { %p76_p1 = scmp.ne.s32.totalorder %s1112_s13, %s1108_s12  ;;  %p77_p2 = scmp.eq.s32.totalorder %s1229_s20, 0 }
  0x1f   : > { %p727_p3 = scmp.ge.s32.totalorder %s1128_s17, 1  ;;  %p139_p4 = scmp.lt.s32.totalorder %s1128_s17, 4 }
  0x20   : > { %p1238_p5 = por %p77_p2, %p76_p1  ;;  %s1134_s25 = smov [#allocation3]  }
  0x21   : > { %p1242_p8 = pnand %p727_p3, %p139_p4  ;;  %s154_s26 = sshll.u32 %s1134_s25, 4  ;;  %s155_s26 = int_to_ptr.vmem [resolvable:$true] %s154_s26 }
  0x22   : > { %s733_s12 = sshll.u32 %s170_s22, 6  ;;  %s781_s27 = sshll.u32 %s1124_s16, 10 }
  0x23   : > { %p839_p9 = pneg %p1242_p8  ;;  %s1260_s6 = scalar_lea.hbm %s1356_s2, %s781_s27 }
  0x24   : > { %s193_s7 = scalar_lea.vmem [#allocation8], %s733_s12  ;;  %s1003_s9 = scalar_lea.vmem %s155_s26, 256 }
  0x25   : > { %p1253_p10 = pnand %p839_p9, %p77_p2  ;;  %s200_s8 = sshll.u32 %s193_s7, 4  ;;  %s1262_s8 = int_to_ptr.vmem [resolvable:$true] %s200_s8 }
  0x26   : > { %p1004_p12 = scmp.ne.s32.totalorder %s155_s26, %s1003_s9  ;;  %p1011_p1 = scmp.lt.s32.totalorder %s155_s26, %s155_s26 }
  0x27   : > { %p994_p11 = pneg %p1253_p10  ;;  %p1012_p3 = scmp.lt.s32.totalorder %s1003_s9, %s1003_s9 }
  0x29   : > { %p1006_p13 = pnand %p1004_p12, %p994_p11  ;;  %p1013_p4 = por %p1012_p3, %p1011_p1 }
  0x2b   : > { %p1007_p0 = pneg %p1006_p13 }
  0x2d   : > { %p1014_p9 = pnand %p1013_p4, %p1007_p0 }
  0x2f   : > { %1017 = shalt.err (!%p1014_p9)
}
  0x30   : > { %s1135_s22 = smov 64   ;;  %s1136_s10 = smov 4  }
  0x31   : > { %842 = dma.hbm_to_vmem [thread:$0]  (!%p1253_p10), %s1354_s0, 256, %s155_s26, [#allocation4], %s1135_s22, %s1135_s22, %s1136_s10  }
  0x32   : > { %s1031_s25 = scalar_lea.vmem %s1262_s8, 1024  ;;  %s1137_s12 = smov [#allocation8]  }
  0x33   : > { %p1032_p11 = scmp.ne.s32.totalorder %s1262_s8, %s1031_s25  ;;  %s1036_s27 = sshll.u32 %s1137_s12, 4  ;;  %s1037_s27 = int_to_ptr.vmem [resolvable:$false] %s1036_s27 }
  0x34   : > { %s1038_s30 = scalar_lea.vmem %s1037_s27, 2048  ;;  %p1039_p0 = scmp.lt.s32.totalorder %s1262_s8, %s1037_s27 }
  0x35   : > { %p1034_p12 = pnand %p1032_p11, %p966_p7  ;;  %p1040_p1 = scmp.lt.s32.totalorder %s1038_s30, %s1031_s25 }
  0x37   : > { %p1035_p13 = pneg %p1034_p12  ;;  %p1041_p3 = por %p1040_p1, %p1039_p0 }
  0x39   : > { %p1042_p4 = pnand %p1041_p3, %p1035_p13 }
  0x3b   : > { %1045 = shalt.err (!%p1042_p4)
}
  0x3c   : > { %849 = dma.hbm_to_vmem [thread:$0]  (!%p1214_p6), %s1260_s6, 1024, %s1262_s8, %s1218_s5, %s1135_s22, %s1135_s22, %s1136_s10  }
  0x3d   : > { %212 = sbr.rel (%p1242_p8) target bundleno = 585 (0x249), region = 32 }
  0x42   : > { %1095 = dma.done.wait (%p77_p2), [#allocation4], 256  }
  0x43   : > { %1097 = vsyncadd (%p77_p2), [#allocation4], 4294967040  ;;  %s218_s26 = sand.u32 1, %s1229_s20   ;;  %s220_s28 = sand.u32 1, %s1112_s13  }
  0x44   : > { %s738_s4 = sshll.u32 %s220_s28, 7  ;;  %s219_s29 = scalar_lea.sflag [#allocation7], %s218_s26 }
  0x45   : > { %s1290_s7 = scalar_lea.vmem [#allocation6], %s738_s4 }
  0x46   : > { %1099 = dma.done.wait (%p1238_p5), %s219_s29, 3072  }
  0x47   : > { %1101 = vsyncadd (%p1238_p5), %s219_s29, 4294964224  ;;  %s739_s5 = sshll.u32 %s220_s28, 6  ;;  %p740_p6 = scmp.ne.s32.totalorder %s1120_s15, 0 }
  0x48   : > { %s1296_s23 = scalar_lea.vmem [#allocation8], %s739_s5 }
  0x49   : > { %262 = sbr.rel (%p740_p6) target bundleno = 81 (0x51), region = 48 }
  0x4e   : > { %v1138_v0 = vmov 0.0  }
  0x4f   : > { %263 = vst [vmem:[#allocation2 + $0x10] sm:$0xff] %v1138_v0  ;;  %264 = vst [vmem:[#allocation2] sm:$0xff] %v1138_v0 }
  0x50   : > { %265 = vst [vmem:[#allocation2 + $0x18] sm:$0xff] %v1138_v0  ;;  %266 = vst [vmem:[#allocation2 + $0x8] sm:$0xff] %v1138_v0 }
  0x51 PF: > { %v914_v1 = vld [vmem:[%s1290_s7 + $0x74] ss:$8 sps:$4 sm:$0xff]   ;;  %v916_v2 = vld [vmem:[%s1290_s7 + $0x70] ss:$8 sps:$4 sm:$0xff]   ;;  %v1139_v3 = vmov 0   ;;  %v942_v22 = vld [vmem:[%s1296_s23 + $0x28] sm:$0xff]  }
  0x52   : > { %411 = vmatprep.mubr.bf16.mxu0 %v1139_v3  ;;  %379 = vmatprep.subr.bf16.mxu0 %v914_v1  ;;  %v917_v4 = vld [vmem:[%s1290_s7 + $0x64] ss:$8 sps:$4 sm:$0xff]   ;;  %v919_v5 = vld [vmem:[%s1290_s7 + $0x60] ss:$8 sps:$4 sm:$0xff]   ;;  %v920_v6 = vld [vmem:[%s1290_s7 + $0x54] ss:$8 sps:$4 sm:$0xff]  }
  0x53   : > { %380 = vmatpush1.bf16.msra.mxu0 %v916_v2  ;;  %v922_v7 = vld [vmem:[%s1290_s7 + $0x50] ss:$8 sps:$4 sm:$0xff]   ;;  %v923_v8 = vld [vmem:[%s1290_s7 + $0x44] ss:$8 sps:$4 sm:$0xff]   ;;  %v925_v9 = vld [vmem:[%s1290_s7 + $0x40] ss:$8 sps:$4 sm:$0xff]  }
  0x54   : > { %381 = vmatprep.subr.bf16.mxu0 %v917_v4  ;;  %v926_v10 = vld [vmem:[%s1290_s7 + $0x34] ss:$8 sps:$4 sm:$0xff]   ;;  %v928_v11 = vld [vmem:[%s1290_s7 + $0x30] ss:$8 sps:$4 sm:$0xff]   ;;  %v929_v12 = vld [vmem:[%s1290_s7 + $0x24] ss:$8 sps:$4 sm:$0xff]  }
  0x55   : > { %v931_v13 = vld [vmem:[%s1290_s7 + $0x20] ss:$8 sps:$4 sm:$0xff]   ;;  %v932_v14 = vld [vmem:[%s1290_s7 + $0x14] ss:$8 sps:$4 sm:$0xff]   ;;  %v934_v15 = vld [vmem:[%s1290_s7 + $0x10] ss:$8 sps:$4 sm:$0xff]  }
  0x56   : > { %v935_v16 = vld [vmem:[%s1290_s7 + $0x4] ss:$8 sps:$4 sm:$0xff]   ;;  %v937_v17 = vld [vmem:[%s1290_s7] ss:$8 sps:$4 sm:$0xff]   ;;  %v938_v18 = vld [vmem:[#allocation3] sm:$0xff]   ;;  %p771_p7 = scmp.ne.s32.totalorder %s1120_s15, 2 }
  0x57   : > { %382 = vmatpush1.bf16.msra.mxu0 %v919_v5  ;;  %v939_v19 = vld [vmem:[#allocation3 + $0x8] sm:$0xff]   ;;  %v941_v21 = vld [vmem:[%s1296_s23 + $0x30] sm:$0xff]   ;;  %v943_v23 = vld [vmem:[%s1296_s23 + $0x20] sm:$0xff]  }
  0x58   : > { %383 = vmatprep.subr.bf16.mxu0 %v920_v6  ;;  %v940_v20 = vld [vmem:[%s1296_s23 + $0x38] sm:$0xff]   ;;  %v945_v25 = vld [vmem:[%s1296_s23 + $0x10] sm:$0xff]   ;;  %v946_v26 = vld [vmem:[%s1296_s23 + $0x8] sm:$0xff]  }
  0x59   : > { %807 = vmatprep.subr.bf16.mxu1 %v940_v20  ;;  %v944_v24 = vld [vmem:[%s1296_s23 + $0x18] sm:$0xff]   ;;  %v947_v27 = vld [vmem:[%s1296_s23] sm:$0xff]   ;;  %v466_v62 = vld [vmem:[#allocation2 + $0x18] sm:$0xff] }
  0x5a   : > { %808 = vmatpush3.bf16.msra.mxu1 %v940_v20  ;;  %v464_v0 = vld [vmem:[#allocation2 + $0x10] sm:$0xff]  ;;  %v465_v6 = vld [vmem:[#allocation2] sm:$0xff] }
  0x5b   : > { %384 = vmatpush1.bf16.msra.mxu0 %v922_v7  ;;  %809 = vmatprep.subr.bf16.mxu1 %v941_v21 }
  0x5c   : > { %385 = vmatprep.subr.bf16.mxu0 %v923_v8 }
  0x5e   : > { %810 = vmatpush3.bf16.msra.mxu1 %v941_v21 }
  0x5f   : > { %386 = vmatpush1.bf16.msra.mxu0 %v925_v9  ;;  %811 = vmatprep.subr.bf16.mxu1 %v942_v22 }
  0x60   : > { %387 = vmatprep.subr.bf16.mxu0 %v926_v10 }
  0x62   : > { %812 = vmatpush3.bf16.msra.mxu1 %v942_v22 }
  0x63   : > { %388 = vmatpush1.bf16.msra.mxu0 %v928_v11  ;;  %813 = vmatprep.subr.bf16.mxu1 %v943_v23 }
  0x64   : > { %389 = vmatprep.subr.bf16.mxu0 %v929_v12 }
  0x66   : > { %814 = vmatpush3.bf16.msra.mxu1 %v943_v23 }
  0x67   : > { %390 = vmatpush1.bf16.msra.mxu0 %v931_v13  ;;  %815 = vmatprep.subr.bf16.mxu1 %v944_v24 }
  0x68   : > { %391 = vmatprep.subr.bf16.mxu0 %v932_v14 }
  0x6a   : > { %816 = vmatpush3.bf16.msra.mxu1 %v944_v24 }
  0x6b   : > { %392 = vmatpush1.bf16.msra.mxu0 %v934_v15  ;;  %817 = vmatprep.subr.bf16.mxu1 %v945_v25 }
  0x6c   : > { %393 = vmatprep.subr.bf16.mxu0 %v935_v16 }
  0x6e   : > { %818 = vmatpush3.bf16.msra.mxu1 %v945_v25 }
  0x6f   : > { %394 = vmatpush1.bf16.msra.mxu0 %v937_v17  ;;  %819 = vmatprep.subr.bf16.mxu1 %v946_v26 }
  0x72   : > { %412 = vmatmul.mubr.bf16.vlgmr.msra.gmra.mxu0 %v938_v18  ;;  %820 = vmatpush3.bf16.msra.mxu1 %v946_v26 }
  0x73   : > { %421 = vmatprep.mubr.bf16.mxu0 %v1139_v3  ;;  %821 = vmatprep.subr.bf16.mxu1 %v947_v27  ;;  %v467_v3 = vld [vmem:[#allocation2 + $0x8] sm:$0xff] }
  0x76   : > { %822 = vmatpush3.bf16.msra.mxu1 %v947_v27 }
  0x7a   : > { %422 = vmatmul.mubr.bf16.gmra.mxu0 %v939_v19 }
 0x132   : > { %v413_v28 = vpop.f32.mrf.mxu0 }
 0x133   : > { %v759_v29 = vmul.f32 -1.442695, %v413_v28 }
 0x134   : > { %v415_v30 = vpop.f32.mrf.mxu0 }
 0x135   : > { %948 = vpow2.f32 %v759_v29 }
 0x136   : > { %v417_v31 = vpop.f32.mrf.mxu0 }
 0x137   : > { %v760_v32 = vmul.f32 -1.442695, %v417_v31 }
 0x138   : > { %v419_v33 = vpop.f32.mrf.mxu0 }
 0x139   : > { %950 = vpow2.f32 %v760_v32 }
 0x13a   : > { %v423_v34 = vpop.f32.mrf.mxu0 }
 0x13b   : > { %v761_v35 = vmul.f32 -1.442695, %v423_v34 }
 0x13c   : > { %v425_v36 = vpop.f32.mrf.mxu0 }
 0x13d   : > { %952 = vpow2.f32 %v761_v35 }
 0x13e   : > { %v427_v37 = vpop.f32.mrf.mxu0 }
 0x13f   : > { %v762_v38 = vmul.f32 -1.442695, %v427_v37 }
 0x140   : > { %v429_v58 = vpop.f32.mrf.mxu0 }
 0x141   : > { %954 = vpow2.f32 %v762_v38 }
 0x142   : > { %v949_v39 = vpop.eup %948 }
 0x143   : > { %v444_v40 = vadd.f32 1.0, %v949_v39 }
 0x145   : > { %956 = vrcp.f32 %v444_v40 }
 0x146   : > { %v951_v41 = vpop.eup %950 }
 0x147   : > { %v445_v42 = vadd.f32 1.0, %v951_v41 }
 0x149   : > { %958 = vrcp.f32 %v445_v42 }
 0x14a   : > { %v953_v43 = vpop.eup %952 }
 0x14b   : > { %v446_v44 = vadd.f32 1.0, %v953_v43 }
 0x14d   : > { %960 = vrcp.f32 %v446_v44 }
 0x14e   : > { %v955_v45 = vpop.eup %954 }
 0x14f   : > { %v447_v46 = vadd.f32 1.0, %v955_v45 }
 0x151   : > { %962 = vrcp.f32 %v447_v46 }
 0x152   : > { %v957_v47 = vpop.eup %956 }
 0x153   : > { %v456_v48 = vmul.f32 %v957_v47, %v413_v28 }
 0x155   : > { %v460_v51 = vmul.f32 %v456_v48, %v415_v30 }
 0x156   : > { %v959_v49 = vpop.eup %958 }
 0x157   : > { %v457_v50 = vmul.f32 %v959_v49, %v417_v31 }
 0x159   : > { %v461_v52 = vmul.f32 %v457_v50, %v419_v33 }
 0x15a   : > { %v961_v53 = vpop.eup %960 }
 0x15b   : > { %v468_v54 = vpack.c.bf16 %v461_v52, %v460_v51  ;;  %v458_v55 = vmul.f32 %v961_v53, %v423_v34 }
 0x15d   : > { %823 = vmatprep.mubr.bf16.mxu1 %v468_v54  ;;  %v462_v59 = vmul.f32 %v458_v55, %v425_v36 }
 0x15e   : > { %v963_v56 = vpop.eup %962 }
 0x15f   : > { %v459_v57 = vmul.f32 %v963_v56, %v427_v37 }
 0x161   : > { %v463_v60 = vmul.f32 %v459_v57, %v429_v58 }
 0x163   : > { %v469_v61 = vpack.c.bf16 %v463_v60, %v462_v59 }
 0x165   : > { %824 = vmatmul.mubr.bf16.vlgmr.msra.gmra.mxu1 %v469_v61 }
 0x225   : > { %v825_v63 = vpop.f32.mrf.mxu1 }
 0x226   : > { %v585_v1 = vadd.f32 %v825_v63, %v466_v62 }
 0x227   : > { %v568_v2 = vpop.f32.mrf.mxu1 }
 0x228   : > { %589 = vst [vmem:[#allocation2 + $0x18] sm:$0xff] %v585_v1  ;;  %v583_v4 = vadd.f32 %v568_v2, %v464_v0 }
 0x229   : > { %v826_v5 = vpop.f32.mrf.mxu1 }
 0x22a   : > { %587 = vst [vmem:[#allocation2 + $0x10] sm:$0xff] %v583_v4  ;;  %v586_v7 = vadd.f32 %v826_v5, %v467_v3  ;;  %594 = sbr.rel (%p771_p7) target bundleno = 569 (0x239), region = 52 }
 0x22b   : > { %v571_v8 = vpop.f32.mrf.mxu1 }
 0x22c   : > { %590 = vst [vmem:[#allocation2 + $0x8] sm:$0xff] %v586_v7  ;;  %v584_v9 = vadd.f32 %v571_v8, %v465_v6 }
 0x22e   : > { %588 = vst [vmem:[#allocation2] sm:$0xff] %v584_v9 }
 0x22f   : > { %v597_v12 = vld [vmem:[#allocation2 + $0x18] sm:$0xff] }
 0x231   : > { %v595_v10 = vld [vmem:[#allocation2 + $0x10] sm:$0xff] }
 0x233   : > { %v598_v14 = vld [vmem:[#allocation2 + $0x8] sm:$0xff] }
 0x234   : > { %v794_v15 = vpack.c.bf16 %v598_v14, %v597_v12 }
 0x235   : > { %v596_v11 = vld [vmem:[#allocation2] sm:$0xff] }
 0x236   : > { %v789_v13 = vpack.c.bf16 %v596_v11, %v595_v10  ;;  %796 = vst [vmem:[#allocation9 + $0x8] sm:$0xff] %v794_v15  }
 0x238   : > { %790 = vst [vmem:[#allocation9] sm:$0xff] %v789_v13  }
 0x239 PF: > { %p853_p2 = scmp.eq.s32.totalorder %s1229_s20, 2  ;;  %s1140_s21 = smov [#allocation9]  }
 0x23a   : > { %s628_s6 = sshll.u32 %s1140_s21, 4  ;;  %s629_s6 = int_to_ptr.vmem [resolvable:$true] %s628_s6 }
 0x23b   : > { %s1046_s8 = scalar_lea.vmem %s629_s6, 256  ;;  %p1053_p9 = scmp.lt.s32.totalorder %s629_s6, %s629_s6 }
 0x23c   : > { %p1047_p5 = scmp.ne.s32.totalorder %s629_s6, %s1046_s8  ;;  %p1054_p11 = scmp.lt.s32.totalorder %s1046_s8, %s1046_s8 }
 0x23e   : > { %p1048_p8 = pnand %p1047_p5, %p853_p2  ;;  %p1055_p12 = por %p1054_p11, %p1053_p9 }
 0x240   : > { %p1049_p10 = pneg %p1048_p8 }
 0x242   : > { %p1056_p13 = pnand %p1055_p12, %p1049_p10 }
 0x244   : > { %1059 = shalt.err (!%p1056_p13)
}
 0x245   : > { %s1141_s15 = smov 64   ;;  %s1142_s9 = smov 4  }
 0x246   : > { %836 = dma.vmem_to_hbm [thread:$0]  (%p853_p2), %s629_s6, 256, %s1357_s3, [#allocation5], %s1141_s15, %s1141_s15, %s1142_s9  }
 0x247   : > { %1103 = dma.done.wait (%p853_p2), [#allocation5], 256  }
 0x248   : > { %1105 = vsyncadd (%p853_p2), [#allocation5], 4294967040 }
 0x249 PF: > { %s18_s17 = sadd.s32 1, %s1128_s17   ;;  %s1362_s12 = smov %s1112_s13 }
 0x24a   : > { %p15_p0 = scmp.ge.s32.totalorder %s18_s17, 5   ;;  %s1363_s13 = smov %s1116_s14 }
 0x24b   : > { %s1364_s14 = smov %s1207_s24  ;;  %s1365_s15 = smov %s1124_s16 }
 0x24c   : > { %s1366_s16 = smov %s1368_s18  ;;  %17 = sbr.rel (!%p15_p0) target bundleno = 6 (0x6), region = 95 }
 0x251   :  { %644 = vsyncpa [#allocation4], 1 }
 0x252   :  { %646 = vsyncpa [#allocation4 + $0x1], 1 }
 0x253   :  { %647 = vsyncpa [#allocation7], 1 }
 0x254   :  { %649 = vsyncpa [#allocation7 + $0x1], 1 }
 0x255   :  { %650 = vsyncpa [#allocation5], 1 }
 0x256   :  { %652 = vsyncpa [#allocation5 + $0x1], 1 }

</bundles_post_ra>
